<compile_context>
chip_gen: v6e
topology: v6e:2x2x1
jax: 0.10.0
libtpu: 0.0.40
codegen_flags: <defaults>
</compile_context>

<pallas_src>
import jax
import jax.numpy as jnp
from jax.experimental import pallas as pl
from jax.experimental.pallas import tpu as pltpu


def swiglu_ffn_kernel(x_ref, w1_ref, b1_ref, w2_ref, b2_ref, w3_ref, b3_ref,
                      o_ref, acc_ref):
    # x_ref:   (tm, Kp)   bf16 token tile (resident across the hidden axis)
    # w1_ref:  (Kp, th)   gate-half weight chunk        b1_ref: (1, th) f32
    # w2_ref:  (Kp, th)   value-half weight chunk       b2_ref: (1, th) f32
    # w3_ref:  (th, Np)   output-proj weight chunk      b3_ref: (1, Np) f32
    # o_ref:   (tm, Np)   output tile
    # acc_ref: (tm, Np)   f32 accumulator scratch (persists across h steps)
    h = pl.program_id(1)

    @pl.when(h == 0)
    def _init():
        acc_ref[...] = jnp.zeros_like(acc_ref)

    x = x_ref[...]
    # Gate / value half-projections for this hidden chunk (f32 accumulation on MXU).
    x1 = jnp.dot(x, w1_ref[...], preferred_element_type=jnp.float32) + b1_ref[...]
    x2 = jnp.dot(x, w2_ref[...], preferred_element_type=jnp.float32) + b2_ref[...]
    # SwiGLU gate in f32: silu(x1) * x2.  sigmoid -> EUP, muls -> VPU.
    gated = x2 * (x1 * jax.nn.sigmoid(x1))
    # Accumulate this hidden chunk's contribution to the output projection.
    acc_ref[...] += jnp.dot(gated.astype(w3_ref.dtype), w3_ref[...],
                            preferred_element_type=jnp.float32)

    @pl.when(h == pl.num_programs(1) - 1)
    def _finalize():
        o_ref[...] = (acc_ref[...] + b3_ref[...]).astype(o_ref.dtype)


def _round_up(n, m):
    return ((n + m - 1) // m) * m


def _pad2d(a, rows, cols):
    r, c = a.shape
    if r == rows and c == cols:
        return a
    return jnp.pad(a, ((0, rows - r), (0, cols - c)))


def swiglu_ffn(x, w12, b12, w3, b3, *, tm=512, th=512,
               compute_dtype=jnp.bfloat16):
    """SwiGLU FFN forward.

    x:   (B, S, D_in)
    w12: (D_in, 2*H)  (torch weight pre-transposed to (in, out))
    b12: (2*H,)
    w3:  (H, D_out)
    b3:  (D_out,)
    """
    B, S, D_in = x.shape
    two_h = w12.shape[1]
    H = two_h // 2
    D_out = w3.shape[1]
    M = B * S
    out_dtype = x.dtype

    # Lane-dense padded sizes (multiples of 128) and tile sizes.
    Kp = _round_up(D_in, 128)
    Np = _round_up(D_out, 128)
    th = _round_up(min(th, _round_up(H, 128)), 128)
    Hp = _round_up(H, th)
    tm = _round_up(min(tm, _round_up(M, 8)), 8)
    Mp = _round_up(M, tm)

    # Split the fused first projection into gate / value halves
    # (matches torch.chunk(2, dim=-1)).
    w1 = w12[:, :H]
    w2 = w12[:, H:]
    b1 = b12[:H].reshape(1, H)
    b2 = b12[H:].reshape(1, H)
    b3_2d = b3.reshape(1, D_out)

    # Pad + cast: matmul operands in bf16 (f32 MXU accumulation), biases f32.
    xp = _pad2d(x.reshape(M, D_in).astype(compute_dtype), Mp, Kp)
    w1p = _pad2d(w1.astype(compute_dtype), Kp, Hp)
    w2p = _pad2d(w2.astype(compute_dtype), Kp, Hp)
    w3p = _pad2d(w3.astype(compute_dtype), Hp, Np)
    b1p = _pad2d(b1.astype(jnp.float32), 1, Hp)
    b2p = _pad2d(b2.astype(jnp.float32), 1, Hp)
    b3p = _pad2d(b3_2d.astype(jnp.float32), 1, Np)

    cd_itemsize = jnp.dtype(compute_dtype).itemsize
    out_itemsize = jnp.dtype(out_dtype).itemsize

    # Advisory cost estimate for the XLA scheduler.
    cost = pl.CostEstimate(
        flops=2 * M * D_in * 2 * H + 2 * M * H * D_out,
        transcendentals=M * H,
        bytes_accessed=(xp.size + w1p.size + w2p.size + w3p.size) * cd_itemsize
        + (b1p.size + b2p.size + b3p.size) * 4
        + Mp * Np * out_itemsize,
    )

    # VMEM budget: pipelined (double-buffered) tiles + f32 accumulator and
    # gate intermediates.  Keep the explicit limit below v7x's 64 MiB VMEM.
    vmem_need = (
        2 * tm * Kp * cd_itemsize            # x tile (2 bufs)
        + 2 * 2 * Kp * th * cd_itemsize      # w1 + w2 chunks (2 bufs each)
        + 2 * th * Np * cd_itemsize          # w3 chunk (2 bufs)
        + 2 * (2 * th + Np) * 4              # biases (2 bufs)
        + 2 * tm * Np * out_itemsize         # out tile (2 bufs)
        + tm * Np * 4                        # f32 accumulator scratch
        + 3 * tm * th * 4                    # x1 / x2 / gate intermediates
    )
    vmem_limit = int(min(max(2 * vmem_need, 32 * 1024 * 1024),
                         56 * 1024 * 1024))

    out2d = pl.pallas_call(
        swiglu_ffn_kernel,
        out_shape=jax.ShapeDtypeStruct((Mp, Np), out_dtype),
        grid_spec=pltpu.PrefetchScalarGridSpec(
            num_scalar_prefetch=0,
            grid=(Mp // tm, Hp // th),
            in_specs=[
                pl.BlockSpec((tm, Kp), lambda i, h: (i, 0)),   # x (constant in h)
                pl.BlockSpec((Kp, th), lambda i, h: (0, h)),   # w1
                pl.BlockSpec((1, th), lambda i, h: (0, h)),    # b1
                pl.BlockSpec((Kp, th), lambda i, h: (0, h)),   # w2
                pl.BlockSpec((1, th), lambda i, h: (0, h)),    # b2
                pl.BlockSpec((th, Np), lambda i, h: (h, 0)),   # w3
                pl.BlockSpec((1, Np), lambda i, h: (0, 0)),    # b3
            ],
            out_specs=pl.BlockSpec((tm, Np), lambda i, h: (i, 0)),
            scratch_shapes=[pltpu.VMEM((tm, Np), jnp.float32)],
        ),
        compiler_params=pltpu.CompilerParams(
            dimension_semantics=("parallel", "arbitrary"),
            vmem_limit_bytes=vmem_limit,
        ),
        cost_estimate=cost,
    )(xp, w1p, b1p, w2p, b2p, w3p, b3p)

    return out2d[:M, :D_out].reshape(B, S, D_out)


def reference_swiglu_ffn(x, w12, b12, w3, b3):
    """Pure-JAX (f32) reference mirroring the PyTorch forward."""
    h12 = jnp.einsum("bsd,dh->bsh", x, w12) + b12
    hdim = h12.shape[-1] // 2
    x1, x2 = h12[..., :hdim], h12[..., hdim:]
    hidden = jax.nn.silu(x1) * x2
    return jnp.einsum("bsh,ho->bso", hidden, w3) + b3


if __name__ == "__main__":
    key = jax.random.PRNGKey(0)

    def make_params(k, d_in, hdim, d_out):
        kw12, kb12, kw3, kb3 = jax.random.split(k, 4)
        w12 = 0.02 * jax.random.normal(kw12, (d_in, 2 * hdim), dtype=jnp.float32)
        b12 = 0.02 * jax.random.normal(kb12, (2 * hdim,), dtype=jnp.float32)
        w3 = 0.02 * jax.random.normal(kw3, (hdim, d_out), dtype=jnp.float32)
        b3 = 0.02 * jax.random.normal(kb3, (d_out,), dtype=jnp.float32)
        return w12, b12, w3, b3

    # Config 1: small shapes consistent with the module
    # (in_features=32, hidden_features=32 -> 2*hidden=64, out_features=32).
    B, S, D_in, H, D_out = 2, 8, 32, 32, 32
    k1, k2, key = jax.random.split(key, 3)
    x = jax.random.normal(k1, (B, S, D_in), dtype=jnp.float32)
    w12, b12, w3, b3 = make_params(k2, D_in, H, D_out)

    out = jax.block_until_ready(swiglu_ffn(x, w12, b12, w3, b3))
    ref = reference_swiglu_ffn(x, w12, b12, w3, b3)
    assert out.shape == (B, S, D_out)
    # bf16 matmul operands -> loosened tolerance vs. the f32 reference.
    assert jnp.allclose(out, ref, atol=5e-3, rtol=5e-2), \
        float(jnp.max(jnp.abs(out - ref)))

    # Config 2: exercises padding, multi-tile M axis and the hidden-reduction
    # (accumulator) grid axis.
    B2, S2, D_in2, H2, D_out2 = 2, 100, 96, 192, 80
    k3, k4, _ = jax.random.split(key, 3)
    x2 = jax.random.normal(k3, (B2, S2, D_in2), dtype=jnp.float32)
    w12b, b12b, w3b, b3b = make_params(k4, D_in2, H2, D_out2)

    out2 = jax.block_until_ready(
        swiglu_ffn(x2, w12b, b12b, w3b, b3b, tm=128, th=128))
    ref2 = reference_swiglu_ffn(x2, w12b, b12b, w3b, b3b)
    assert out2.shape == (B2, S2, D_out2)
    assert jnp.allclose(out2, ref2, atol=5e-3, rtol=5e-2), \
        float(jnp.max(jnp.abs(out2 - ref2)))

    print("KERNEL_OK")
</pallas_src>

<mosaic_0001>
module attributes {stable_mosaic.version = 11 : i64} {
  func.func @swiglu_ffn_kernel(%arg0: i32, %arg1: i32, %arg2: memref<16x128xbf16, #tpu.memory_space<vmem>>, %arg3: memref<128x128xbf16, #tpu.memory_space<vmem>>, %arg4: memref<1x128xf32, #tpu.memory_space<vmem>>, %arg5: memref<128x128xbf16, #tpu.memory_space<vmem>>, %arg6: memref<1x128xf32, #tpu.memory_space<vmem>>, %arg7: memref<128x128xbf16, #tpu.memory_space<vmem>>, %arg8: memref<1x128xf32, #tpu.memory_space<vmem>>, %arg9: memref<16x128xf32, #tpu.memory_space<vmem>>, %arg10: memref<16x128xf32, #tpu.memory_space<vmem>>) attributes {dimension_semantics = [#tpu.dimension_semantics<parallel>, #tpu.dimension_semantics<arbitrary>], iteration_bounds = array<i64: 1, 1>, scalar_prefetch = 0 : i64, scratch_operands = 1 : i64, tpu.core_type = #tpu.core_type<tc>, window_params = [{transform_indices = @transform_0, window_bounds = array<i64: 16, 128>}, {transform_indices = @transform_1, window_bounds = array<i64: 128, 128>}, {transform_indices = @transform_2, window_bounds = array<i64: 1, 128>}, {transform_indices = @transform_3, window_bounds = array<i64: 128, 128>}, {transform_indices = @transform_4, window_bounds = array<i64: 1, 128>}, {transform_indices = @transform_5, window_bounds = array<i64: 128, 128>}, {pipeline_mode = #tpu.pipeline_mode<synchronous>, transform_indices = @transform_6, window_bounds = array<i64: 1, 128>}, {transform_indices = @transform_7, window_bounds = array<i64: 16, 128>}]} {
    %c0_i32 = arith.constant 0 : i32
    %0 = arith.cmpi eq, %arg1, %c0_i32 : i32
    %1 = arith.extui %0 : i1 to i32
    %c0_i32_0 = arith.constant 0 : i32
    %2 = arith.cmpi ne, %1, %c0_i32_0 : i32
    scf.if %2 {
      %cst_21 = arith.constant 0.000000e+00 : f32
      %30 = vector.broadcast %cst_21 : f32 to vector<16x128xf32>
      %c0_22 = arith.constant 0 : index
      %c0_23 = arith.constant 0 : index
      %31 = vector.load %arg10[%c0_22, %c0_23] : memref<16x128xf32, #tpu.memory_space<vmem>>, vector<16x128xf32>
      tpu.vector_store %arg10[%c0_22, %c0_23], %30 {strides = array<i32>} : memref<16x128xf32, #tpu.memory_space<vmem>>, vector<16x128xf32>,
    } else {
    }
    %c0 = arith.constant 0 : index
    %c0_1 = arith.constant 0 : index
    %3 = vector.load %arg2[%c0, %c0_1] : memref<16x128xbf16, #tpu.memory_space<vmem>>, vector<16x128xbf16>
    %c0_2 = arith.constant 0 : index
    %c0_3 = arith.constant 0 : index
    %4 = vector.load %arg3[%c0_2, %c0_3] : memref<128x128xbf16, #tpu.memory_space<vmem>>, vector<128x128xbf16>
    %cst = arith.constant dense<0.000000e+00> : vector<16x128xf32>
    %5 = tpu.matmul %3, %4, %cst {dimension_numbers = #tpu.dot_dimension_numbers<[1], [0], [0], [1], [0, 0, 1, 1], [], []>} : vector<16x128xbf16>, vector<128x128xbf16>, vector<16x128xf32> -> vector<16x128xf32>
    %c0_4 = arith.constant 0 : index
    %c0_5 = arith.constant 0 : index
    %6 = vector.load %arg4[%c0_4, %c0_5] : memref<1x128xf32, #tpu.memory_space<vmem>>, vector<1x128xf32>
    %7 = vector.broadcast %6 : vector<1x128xf32> to vector<16x128xf32>
    %8 = arith.addf %5, %7 : vector<16x128xf32>
    %c0_6 = arith.constant 0 : index
    %c0_7 = arith.constant 0 : index
    %9 = vector.load %arg5[%c0_6, %c0_7] : memref<128x128xbf16, #tpu.memory_space<vmem>>, vector<128x128xbf16>
    %cst_8 = arith.constant dense<0.000000e+00> : vector<16x128xf32>
    %10 = tpu.matmul %3, %9, %cst_8 {dimension_numbers = #tpu.dot_dimension_numbers<[1], [0], [0], [1], [0, 0, 1, 1], [], []>} : vector<16x128xbf16>, vector<128x128xbf16>, vector<16x128xf32> -> vector<16x128xf32>
    %c0_9 = arith.constant 0 : index
    %c0_10 = arith.constant 0 : index
    %11 = vector.load %arg6[%c0_9, %c0_10] : memref<1x128xf32, #tpu.memory_space<vmem>>, vector<1x128xf32>
    %12 = vector.broadcast %11 : vector<1x128xf32> to vector<16x128xf32>
    %13 = arith.addf %10, %12 : vector<16x128xf32>
    %14 = arith.negf %8 : vector<16x128xf32>
    %15 = math.exp %14 : vector<16x128xf32>
    %cst_11 = arith.constant 1.000000e+00 : f32
    %16 = vector.broadcast %cst_11 : f32 to vector<16x128xf32>
    %17 = arith.addf %16, %15 : vector<16x128xf32>
    %18 = arith.divf %16, %17 : vector<16x128xf32>
    %19 = arith.mulf %8, %18 : vector<16x128xf32>
    %20 = arith.mulf %13, %19 : vector<16x128xf32>
    %c0_12 = arith.constant 0 : index
    %c0_13 = arith.constant 0 : index
    %21 = vector.load %arg10[%c0_12, %c0_13] : memref<16x128xf32, #tpu.memory_space<vmem>>, vector<16x128xf32>
    %22 = arith.truncf %20 : vector<16x128xf32> to vector<16x128xbf16>
    %c0_14 = arith.constant 0 : index
    %c0_15 = arith.constant 0 : index
    %23 = vector.load %arg7[%c0_14, %c0_15] : memref<128x128xbf16, #tpu.memory_space<vmem>>, vector<128x128xbf16>
    %cst_16 = arith.constant dense<0.000000e+00> : vector<16x128xf32>
    %24 = tpu.matmul %22, %23, %cst_16 {dimension_numbers = #tpu.dot_dimension_numbers<[1], [0], [0], [1], [0, 0, 1, 1], [], []>} : vector<16x128xbf16>, vector<128x128xbf16>, vector<16x128xf32> -> vector<16x128xf32>
    %25 = arith.addf %21, %24 : vector<16x128xf32>
    %c0_17 = arith.constant 0 : index
    %c0_18 = arith.constant 0 : index
    %26 = vector.load %arg10[%c0_17, %c0_18] : memref<16x128xf32, #tpu.memory_space<vmem>>, vector<16x128xf32>
    tpu.vector_store %arg10[%c0_17, %c0_18], %25 {strides = array<i32>} : memref<16x128xf32, #tpu.memory_space<vmem>>, vector<16x128xf32>,
    %c0_i32_19 = arith.constant 0 : i32
    %27 = arith.cmpi eq, %arg1, %c0_i32_19 : i32
    %28 = arith.extui %27 : i1 to i32
    %c0_i32_20 = arith.constant 0 : i32
    %29 = arith.cmpi ne, %28, %c0_i32_20 : i32
    scf.if %29 {
      %c0_21 = arith.constant 0 : index
      %c0_22 = arith.constant 0 : index
      %30 = vector.load %arg10[%c0_21, %c0_22] : memref<16x128xf32, #tpu.memory_space<vmem>>, vector<16x128xf32>
      %c0_23 = arith.constant 0 : index
      %c0_24 = arith.constant 0 : index
      %31 = vector.load %arg8[%c0_23, %c0_24] : memref<1x128xf32, #tpu.memory_space<vmem>>, vector<1x128xf32>
      %32 = vector.broadcast %31 : vector<1x128xf32> to vector<16x128xf32>
      %33 = arith.addf %30, %32 : vector<16x128xf32>
      %c0_25 = arith.constant 0 : index
      %c0_26 = arith.constant 0 : index
      %34 = vector.load %arg9[%c0_25, %c0_26] : memref<16x128xf32, #tpu.memory_space<vmem>>, vector<16x128xf32>
      tpu.vector_store %arg9[%c0_25, %c0_26], %33 {strides = array<i32>} : memref<16x128xf32, #tpu.memory_space<vmem>>, vector<16x128xf32>,
    } else {
    }
    return
  }
  func.func @transform_0(%arg0: i32, %arg1: i32) -> (i32, i32) {
    %c0_i32 = arith.constant 0 : i32
    %c0_i32_0 = arith.constant 0 : i32
    return %arg0, %c0_i32 : i32, i32
  }
  func.func @transform_1(%arg0: i32, %arg1: i32) -> (i32, i32) {
    %c0_i32 = arith.constant 0 : i32
    %c0_i32_0 = arith.constant 0 : i32
    return %c0_i32, %arg1 : i32, i32
  }
  func.func @transform_2(%arg0: i32, %arg1: i32) -> (i32, i32) {
    %c0_i32 = arith.constant 0 : i32
    %c0_i32_0 = arith.constant 0 : i32
    return %c0_i32, %arg1 : i32, i32
  }
  func.func @transform_3(%arg0: i32, %arg1: i32) -> (i32, i32) {
    %c0_i32 = arith.constant 0 : i32
    %c0_i32_0 = arith.constant 0 : i32
    return %c0_i32, %arg1 : i32, i32
  }
  func.func @transform_4(%arg0: i32, %arg1: i32) -> (i32, i32) {
    %c0_i32 = arith.constant 0 : i32
    %c0_i32_0 = arith.constant 0 : i32
    return %c0_i32, %arg1 : i32, i32
  }
  func.func @transform_5(%arg0: i32, %arg1: i32) -> (i32, i32) {
    %c0_i32 = arith.constant 0 : i32
    %c0_i32_0 = arith.constant 0 : i32
    return %arg1, %c0_i32 : i32, i32
  }
  func.func @transform_6(%arg0: i32, %arg1: i32) -> (i32, i32) {
    %c0_i32 = arith.constant 0 : i32
    %c0_i32_0 = arith.constant 0 : i32
    %c0_i32_1 = arith.constant 0 : i32
    return %c0_i32, %c0_i32_0 : i32, i32
  }
  func.func @transform_7(%arg0: i32, %arg1: i32) -> (i32, i32) {
    %c0_i32 = arith.constant 0 : i32
    %c0_i32_0 = arith.constant 0 : i32
    return %arg0, %c0_i32 : i32, i32
  }
}

</mosaic_0001>

<bundles_post_ra>
// kernel: tpu_custom_call.1
= control target key start
LH: loop header
LB: loop body
LE: loop exit
PB: predicated region body
PF: predicated region fallthrough
CT: control target
= control target key end

     0   :  { %12 = vsyncpa [#allocation4], 0  ;;  %s870_s0 = inlined_call_operand.hbm [shape: bf16[16,128], index: 0, kind: input, shape index: {}]   ;;  %s871_s1 = inlined_call_operand.hbm [shape: bf16[128,128], index: 1, kind: input, shape index: {}]   ;;  %s872_s2 = inlined_call_operand.vmem [shape: f32[1,128], index: 2, kind: input, shape index: {}]   ;;  %s873_s3 = inlined_call_operand.hbm [shape: bf16[128,128], index: 3, kind: input, shape index: {}]   ;;  %s874_s4 = inlined_call_operand.vmem [shape: f32[1,128], index: 4, kind: input, shape index: {}]   ;;  %s875_s5 = inlined_call_operand.hbm [shape: bf16[128,128], index: 5, kind: input, shape index: {}]   ;;  %s876_s6 = inlined_call_operand.vmem [shape: f32[1,128], index: 6, kind: input, shape index: {}]   ;;  %s877_s7 = inlined_call_operand.hbm [shape: f32[16,128], index: 7, kind: output, shape index: {}]  }
   0x1   :  { %13 = vsyncpa [#allocation7], 0 }
   0x2   :  { %14 = vsyncpa [#allocation10], 0 }
   0x3   :  { %15 = vsyncpa [#allocation5], 0  ;;  %s753_s24 = smov [#allocation6]   ;;  %s754_s26 = smov [#allocation3]  }
   0x4   :  { %s33_s25 = sshll.u32 %s753_s24, 4  ;;  %s21_s27 = sshll.u32 %s754_s26, 4  ;;  %s34_s25 = int_to_ptr.vmem [resolvable:$true] %s33_s25  ;;  %s22_s27 = int_to_ptr.vmem [resolvable:$true] %s21_s27 }
   0x5   :  { %s653_s28 = scalar_lea.vmem %s34_s25, 1024  ;;  %p658_p1 = scmp.lt.s32.totalorder %s34_s25, %s34_s25 }
   0x6   :  { %p654_p0 = scmp.ne.s32.totalorder %s34_s25, %s653_s28  ;;  %p659_p2 = scmp.lt.s32.totalorder %s653_s28, %s653_s28 }
   0x8   :  { %p660_p3 = por %p659_p2, %p658_p1 }
   0xa   :  { %p661_p4 = pnand %p660_p3, %p654_p0 }
   0xc   :  { %664 = shalt.err (!%p661_p4)
}
   0xd   :  { %s755_s29 = smov 64   ;;  %s756_s30 = smov 4  }
   0xe   :  { %39 = dma.hbm_to_vmem [thread:$0]  %s871_s1, 1024, %s34_s25, [#allocation7], %s755_s29, %s755_s29, %s756_s30  }
   0xf   :  { %s673_s10 = scalar_lea.vmem %s22_s27, 128  ;;  %p678_p6 = scmp.lt.s32.totalorder %s22_s27, %s22_s27 }
  0x10   :  { %p674_p5 = scmp.ne.s32.totalorder %s22_s27, %s673_s10  ;;  %p679_p7 = scmp.lt.s32.totalorder %s673_s10, %s673_s10 }
  0x12   :  { %p680_p8 = por %p679_p7, %p678_p6 }
  0x14   :  { %p681_p9 = pnand %p680_p8, %p674_p5 }
  0x16   :  { %684 = shalt.err (!%p681_p9)
}
  0x17   :  { %27 = dma.hbm_to_vmem [thread:$0]  %s870_s0, 128, %s22_s27, [#allocation4], %s755_s29, %s755_s29, %s756_s30  }
  0x18   :  { %s757_s13 = smov [#allocation8]   ;;  %s758_s15 = smov [#allocation9]  }
  0x19   :  { %s47_s14 = sshll.u32 %s757_s13, 4  ;;  %s61_s16 = sshll.u32 %s758_s15, 4  ;;  %s48_s14 = int_to_ptr.vmem [resolvable:$true] %s47_s14  ;;  %s62_s16 = int_to_ptr.vmem [resolvable:$true] %s61_s16 }
  0x1a   :  { %s693_s1 = scalar_lea.vmem %s48_s14, 1024  ;;  %p698_p11 = scmp.lt.s32.totalorder %s48_s14, %s48_s14 }
  0x1b   :  { %p694_p10 = scmp.ne.s32.totalorder %s48_s14, %s693_s1  ;;  %p699_p12 = scmp.lt.s32.totalorder %s693_s1, %s693_s1 }
  0x1d   :  { %p700_p13 = por %p699_p12, %p698_p11 }
  0x1f   :  { %p701_p0 = pnand %p700_p13, %p694_p10 }
  0x21   :  { %704 = shalt.err (!%p701_p0)
}
  0x22   :  { %53 = dma.hbm_to_vmem [thread:$0]  %s873_s3, 1024, %s48_s14, [#allocation7], %s755_s29, %s755_s29, %s756_s30  }
  0x23   :  { %s713_s0 = scalar_lea.vmem %s62_s16, 1024  ;;  %p718_p2 = scmp.lt.s32.totalorder %s62_s16, %s62_s16 }
  0x24   :  { %p714_p1 = scmp.ne.s32.totalorder %s62_s16, %s713_s0  ;;  %p719_p3 = scmp.lt.s32.totalorder %s713_s0, %s713_s0 }
  0x26   :  { %p720_p4 = por %p719_p3, %p718_p2 }
  0x28   :  { %p721_p5 = pnand %p720_p4, %p714_p1 }
  0x2a   :  { %724 = shalt.err (!%p721_p5)
}
  0x2b   :  { %67 = dma.hbm_to_vmem [thread:$0]  %s875_s5, 1024, %s62_s16, [#allocation10], %s755_s29, %s755_s29, %s756_s30  }
  0x2c   :  { %745 = dma.done.wait [#allocation4], 128  }
  0x2d   :  { %746 = vsyncadd [#allocation4], 4294967168 }
  0x2e   :  { %747 = dma.done.wait [#allocation7], 2048  }
  0x2f   :  { %748 = vsyncadd [#allocation7], 4294965248 }
  0x30   :  { %749 = dma.done.wait [#allocation10], 1024  }
  0x31   :  { %750 = vsyncadd [#allocation10], 4294966272  ;;  %v759_v0 = vmov 0.0   ;;  %vm760_vm0 = vmmov 0   ;;  %v612_v1 = vld [vmem:[#allocation6 + $0x38] sm:$0xff]   ;;  %v613_v2 = vld [vmem:[#allocation6 + $0x30] sm:$0xff]  }
  0x32   :  { %541 = vmatprep.subr.bf16.mxu0 %v759_v0  ;;  %561 = vmatprep.subr.bf16.mxu1 %v759_v0  ;;  %v614_v3 = vld [vmem:[#allocation6 + $0x28] sm:$0xff]   ;;  %v620_v4 = vld [vmem:[#allocation8 + $0x38] sm:$0xff]   ;;  %v615_v5 = vld [vmem:[#allocation6 + $0x20] sm:$0xff]   ;;  %s761_s24 = smov [#allocation11]  }
  0x33   :  { %557 = vmatprep.mubr.msk.bf16.mxu0 %vm760_vm0, %v759_v0  ;;  %577 = vmatprep.mubr.msk.bf16.mxu1 %vm760_vm0, %v759_v0  ;;  %v622_v6 = vld [vmem:[#allocation8 + $0x30] sm:$0xff]   ;;  %v616_v7 = vld [vmem:[#allocation6 + $0x18] sm:$0xff]   ;;  %v623_v8 = vld [vmem:[#allocation8 + $0x28] sm:$0xff]   ;;  %s470_s25 = sshll.u32 %s761_s24, 4  ;;  %s471_s25 = int_to_ptr.vmem [resolvable:$true] %s470_s25 }
  0x34   :  { %542 = vmatpush3.bf16.msra.mxu0 %v612_v1  ;;  %562 = vmatpush3.bf16.msra.mxu1 %v620_v4  ;;  %v617_v9 = vld [vmem:[#allocation6 + $0x10] sm:$0xff]   ;;  %v624_v10 = vld [vmem:[#allocation8 + $0x20] sm:$0xff]   ;;  %v618_v11 = vld [vmem:[#allocation6 + $0x8] sm:$0xff]   ;;  %p730_p7 = scmp.lt.s32.totalorder %s471_s25, %s471_s25 }
  0x35   :  { %543 = vmatprep.subr.bf16.mxu0 %v759_v0  ;;  %563 = vmatprep.subr.bf16.mxu1 %v759_v0  ;;  %v625_v12 = vld [vmem:[#allocation8 + $0x18] sm:$0xff]   ;;  %v619_v13 = vld [vmem:[#allocation6] sm:$0xff]   ;;  %v626_v14 = vld [vmem:[#allocation8 + $0x10] sm:$0xff]  }
  0x36   :  { %v621_v15 = vld [vmem:[#allocation3] sm:$0xff]   ;;  %v627_v16 = vld [vmem:[#allocation8 + $0x8] sm:$0xff]   ;;  %v628_v17 = vld [vmem:[#allocation8] sm:$0xff]  }
  0x37   :  { %v629_v18 = vld [vmem:[#allocation9 + $0x38] sm:$0xff]   ;;  %v630_v19 = vld [vmem:[#allocation9 + $0x30] sm:$0xff]   ;;  %v631_v20 = vld [vmem:[#allocation9 + $0x28] sm:$0xff]  }
  0x38   :  { %544 = vmatpush3.bf16.msra.mxu0 %v613_v2  ;;  %564 = vmatpush3.bf16.msra.mxu1 %v622_v6  ;;  %v632_v21 = vld [vmem:[#allocation9 + $0x20] sm:$0xff]   ;;  %v633_v22 = vld [vmem:[#allocation9 + $0x18] sm:$0xff]   ;;  %v634_v23 = vld [vmem:[#allocation9 + $0x10] sm:$0xff]  }
  0x39   :  { %545 = vmatprep.subr.bf16.mxu0 %v759_v0  ;;  %565 = vmatprep.subr.bf16.mxu1 %v759_v0  ;;  %v635_v24 = vld [vmem:[#allocation9 + $0x8] sm:$0xff]   ;;  %v636_v25 = vld [vmem:[#allocation9] sm:$0xff]   ;;  %v484_v26 = vld [vmem:[%s872_s2] ss:$0 sm:$0xff] }
  0x3a   :  { %v494_v44 = vld [vmem:[%s874_s4] ss:$0 sm:$0xff]  ;;  %s725_s4 = scalar_lea.vmem %s471_s25, 256 }
  0x3b   :  { %v513_v53 = vld [vmem:[%s876_s6] ss:$0 sm:$0xff]  ;;  %p726_p6 = scmp.ne.s32.totalorder %s471_s25, %s725_s4  ;;  %p731_p8 = scmp.lt.s32.totalorder %s725_s4, %s725_s4 }
  0x3c   :  { %546 = vmatpush3.bf16.msra.mxu0 %v614_v3  ;;  %566 = vmatpush3.bf16.msra.mxu1 %v623_v8 }
  0x3d   :  { %547 = vmatprep.subr.bf16.mxu0 %v759_v0  ;;  %567 = vmatprep.subr.bf16.mxu1 %v759_v0  ;;  %p732_p9 = por %p731_p8, %p730_p7 }
  0x3f   :  { %p733_p10 = pnand %p732_p9, %p726_p6 }
  0x40   :  { %548 = vmatpush3.bf16.msra.mxu0 %v615_v5  ;;  %568 = vmatpush3.bf16.msra.mxu1 %v624_v10 }
  0x41   :  { %549 = vmatprep.subr.bf16.mxu0 %v759_v0  ;;  %569 = vmatprep.subr.bf16.mxu1 %v759_v0 }
  0x44   :  { %550 = vmatpush3.bf16.msra.mxu0 %v616_v7  ;;  %570 = vmatpush3.bf16.msra.mxu1 %v625_v12 }
  0x45   :  { %551 = vmatprep.subr.bf16.mxu0 %v759_v0  ;;  %571 = vmatprep.subr.bf16.mxu1 %v759_v0 }
  0x48   :  { %552 = vmatpush3.bf16.msra.mxu0 %v617_v9  ;;  %572 = vmatpush3.bf16.msra.mxu1 %v626_v14 }
  0x49   :  { %553 = vmatprep.subr.bf16.mxu0 %v759_v0  ;;  %573 = vmatprep.subr.bf16.mxu1 %v759_v0 }
  0x4c   :  { %554 = vmatpush3.bf16.msra.mxu0 %v618_v11  ;;  %574 = vmatpush3.bf16.msra.mxu1 %v627_v16 }
  0x4d   :  { %555 = vmatprep.subr.bf16.mxu0 %v759_v0  ;;  %575 = vmatprep.subr.bf16.mxu1 %v759_v0 }
  0x50   :  { %556 = vmatpush3.bf16.msra.mxu0 %v619_v13  ;;  %576 = vmatpush3.bf16.msra.mxu1 %v628_v17 }
  0x51   :  { %581 = vmatprep.subr.bf16.mxu0 %v759_v0 }
  0x53   :  { %558 = vmatmul.mubr.bf16.vlgmr.msra.gmra.mxu0 %v621_v15  ;;  %578 = vmatmul.mubr.bf16.vlgmr.msra.gmra.mxu1 %v621_v15 }
  0x54   :  { %597 = vmatprep.mubr.msk.bf16.mxu0 %vm760_vm0, %v759_v0  ;;  %582 = vmatpush3.bf16.msra.mxu0 %v629_v18 }
  0x55   :  { %583 = vmatprep.subr.bf16.mxu0 %v759_v0 }
  0x58   :  { %584 = vmatpush3.bf16.msra.mxu0 %v630_v19 }
  0x59   :  { %585 = vmatprep.subr.bf16.mxu0 %v759_v0 }
  0x5c   :  { %586 = vmatpush3.bf16.msra.mxu0 %v631_v20 }
  0x5d   :  { %587 = vmatprep.subr.bf16.mxu0 %v759_v0 }
  0x60   :  { %588 = vmatpush3.bf16.msra.mxu0 %v632_v21 }
  0x61   :  { %589 = vmatprep.subr.bf16.mxu0 %v759_v0 }
  0x64   :  { %590 = vmatpush3.bf16.msra.mxu0 %v633_v22 }
  0x65   :  { %591 = vmatprep.subr.bf16.mxu0 %v759_v0 }
  0x68   :  { %592 = vmatpush3.bf16.msra.mxu0 %v634_v23 }
  0x69   :  { %593 = vmatprep.subr.bf16.mxu0 %v759_v0 }
  0x6c   :  { %594 = vmatpush3.bf16.msra.mxu0 %v635_v24 }
  0x6d   :  { %595 = vmatprep.subr.bf16.mxu0 %v759_v0 }
  0x70   :  { %596 = vmatpush3.bf16.msra.mxu0 %v636_v25 }
 0x113   :  { %v202_v27 = vpop.f32.mrf.mxu0  ;;  %v314_v35 = vpop.f32.mrf.mxu1 }
 0x114   :  { %v203_v28 = vadd.f32 %v484_v26, %v202_v27  ;;  %v315_v46 = vadd.f32 %v494_v44, %v314_v35 }
 0x115   :  { %v559_v29 = vpop.f32.mrf.mxu0  ;;  %v579_v36 = vpop.f32.mrf.mxu1 }
 0x116   :  { %v503_v30 = vmul.f32 -1.442695, %v203_v28 }
 0x117   :  { %v205_v31 = vpop.f32.mrf.mxu0  ;;  %v317_v37 = vpop.f32.mrf.mxu1 }
 0x118   :  { %637 = vpow2.f32 %v503_v30  ;;  %v206_v32 = vadd.f32 %v484_v26, %v205_v31  ;;  %v318_v49 = vadd.f32 %v494_v44, %v317_v37 }
 0x119   :  { %v560_v33 = vpop.f32.mrf.mxu0  ;;  %v580_v38 = vpop.f32.mrf.mxu1 }
 0x11a   :  { %v504_v34 = vmul.f32 -1.442695, %v206_v32 }
 0x11c   :  { %639 = vpow2.f32 %v504_v34 }
 0x125   :  { %v638_v39 = vpop.eup %637 }
 0x126   :  { %v327_v40 = vadd.f32 1.0, %v638_v39 }
 0x128   :  { %641 = vrcp.f32 %v327_v40 }
 0x129   :  { %v640_v41 = vpop.eup %639 }
 0x12a   :  { %v328_v42 = vadd.f32 1.0, %v640_v41 }
 0x12c   :  { %643 = vrcp.f32 %v328_v42 }
 0x135   :  { %v642_v43 = vpop.eup %641 }
 0x136   :  { %v333_v45 = vmul.f32 %v642_v43, %v203_v28 }
 0x138   :  { %v335_v50 = vmul.f32 %v333_v45, %v315_v46 }
 0x139   :  { %v644_v47 = vpop.eup %643 }
 0x13a   :  { %v334_v48 = vmul.f32 %v644_v47, %v206_v32 }
 0x13c   :  { %v336_v51 = vmul.f32 %v334_v48, %v318_v49 }
 0x13e   :  { %v339_v52 = vpack.c.bf16 %v336_v51, %v335_v50 }
 0x140   :  { %598 = vmatmul.mubr.bf16.vlgmr.msra.gmra.mxu0 %v339_v52 }
 0x200   :  { %v438_v54 = vpop.f32.mrf.mxu0 }
 0x201   :  { %v461_v55 = vadd.f32 %v513_v53, %v438_v54 }
 0x202   :  { %v599_v56 = vpop.f32.mrf.mxu0 }
 0x203   :  { %463 = vst [vmem:[#allocation11] sm:$0xff] %v461_v55 }
 0x204   :  { %v441_v57 = vpop.f32.mrf.mxu0 }
 0x205   :  { %v462_v58 = vadd.f32 %v513_v53, %v441_v57 }
 0x206   :  { %v600_v59 = vpop.f32.mrf.mxu0 }
 0x207   :  { %464 = vst [vmem:[#allocation11 + $0x8] sm:$0xff] %v462_v58 }
 0x208   :  { %736 = shalt.err (!%p733_p10)
}
 0x209   :  { %s762_s26 = smov 128   ;;  %s763_s6 = smov 8  }
 0x20a   :  { %476 = dma.vmem_to_hbm [thread:$0]  %s471_s25, 256, %s877_s7, [#allocation5], %s762_s26, %s762_s26, %s763_s6  }
 0x20b   :  { %751 = dma.done.wait [#allocation5], 256  }
 0x20c   :  { %752 = vsyncadd [#allocation5], 4294967040 }
 0x20d   :  { %480 = vsyncpa [#allocation4], 1 }
 0x20e   :  { %481 = vsyncpa [#allocation7], 1 }
 0x20f   :  { %482 = vsyncpa [#allocation10], 1 }
 0x210   :  { %483 = vsyncpa [#allocation5], 1 }

</bundles_post_ra>
